<compile_context>
chip_gen: v5e
topology: v5e:2x2
jax: 0.10.0
libtpu: 0.0.40
codegen_flags: <defaults>
</compile_context>

<pallas_src>
import jax
import jax.numpy as jnp
from jax.experimental import pallas as pl
from jax.experimental.pallas import tpu as pltpu

LANE = 128


def _round_up(n, m):
    return ((n + m - 1) // m) * m


def _cdiv(a, b):
    return -(-a // b)


def _mlp_kernel(x_ref, w1_ref, b1_ref, w2_ref, b2_ref, out_ref):
    # In-kernel cast of x to the weight dtype (no-op on the f32 path). Rides the
    # otherwise-idle VPU in this mem-bound kernel instead of a wrapper-side pass.
    x = x_ref[...].astype(w1_ref.dtype)
    # First Linear + ReLU: MXU dot with f32 accumulation, bias/ReLU in f32 on VPU.
    h = jnp.dot(x, w1_ref[...], preferred_element_type=jnp.float32)
    h = jnp.maximum(h + b1_ref[...], 0.0)
    # Second (last) Linear — no activation, matching last_layer=True.
    o = jnp.dot(h.astype(w2_ref.dtype), w2_ref[...],
                preferred_element_type=jnp.float32)
    out_ref[...] = (o + b2_ref[...]).astype(out_ref.dtype)


def prepare_params(w1, b1, w2, b2, *, use_bf16=False):
    """Pad feature dims to 128-lane widths (numerically exact) and optionally
    pre-cast weights to bf16 ONCE (e.g. at episodic-loop setup), so the per-call
    wrapper does no extra XLA work. Biases stay f32 (bias-add/ReLU run in f32).
    Returns (w1p, b1p, w2p, b2p, out_features)."""
    H1, H2 = w1.shape[1], w2.shape[1]
    H1p, H2p = _round_up(H1, LANE), _round_up(H2, LANE)
    w1p = jnp.pad(w1, ((0, 0), (0, H1p - H1)))
    b1p = jnp.pad(b1, ((0, 0), (0, H1p - H1))).astype(jnp.float32)
    w2p = jnp.pad(w2, ((0, H1p - H1), (0, H2p - H2)))
    b2p = jnp.pad(b2, ((0, 0), (0, H2p - H2))).astype(jnp.float32)
    if use_bf16:
        w1p = w1p.astype(jnp.bfloat16)
        w2p = w2p.astype(jnp.bfloat16)
    return w1p, b1p, w2p, b2p, H2


def protonet_encoder_forward(x, w1, b1, w2, b2, *, out_features=None,
                             tile_b=2048, use_bf16=False, out_dtype=None,
                             pad_output=False):
    """x: (B, D). w1: (D, H1), b1: (1, H1), w2: (H1, H2), b2: (1, H2).
    Accepts raw params or ones already padded/cast by prepare_params()."""
    B, D = x.shape
    H1, H2 = w1.shape[1], w2.shape[1]
    if out_features is None:
        out_features = H2
    out_dtype = x.dtype if out_dtype is None else out_dtype

    H1p, H2p = _round_up(H1, LANE), _round_up(H2, LANE)
    if (H1p, H2p) != (H1, H2):
        # Zero-pad hidden/output feature dims to 128 lanes (numerically exact).
        w1 = jnp.pad(w1, ((0, 0), (0, H1p - H1)))
        b1 = jnp.pad(b1, ((0, 0), (0, H1p - H1)))
        w2 = jnp.pad(w2, ((0, H1p - H1), (0, H2p - H2)))
        b2 = jnp.pad(b2, ((0, 0), (0, H2p - H2)))
    if use_bf16:
        # Only the tiny weights get cast here; x stays f32 in HBM and is cast
        # inside the kernel (avoids an extra HBM pass over the biggest input).
        if w1.dtype != jnp.bfloat16:
            w1 = w1.astype(jnp.bfloat16)
        if w2.dtype != jnp.bfloat16:
            w2 = w2.astype(jnp.bfloat16)

    # Batch tile: large to amortize per-grid-step overhead; 16-sublane aligned on
    # the bf16 path. For big batches keep >= 2 grid steps so v7x's two TensorCores
    # both get work (a no-op cost on 1-TC v5e/v6e since each step is still big).
    sub = 16 if use_bf16 else 8
    tb = _round_up(min(tile_b, B), sub)
    if B >= 1024:
        tb = min(tb, _round_up(_cdiv(B, 2), sub))
    grid = (_cdiv(B, tb),)   # ragged last block: reads unspecified tail rows,
                             # but their stores are masked (rows independent).

    # Only raise the scoped-VMEM limit if a caller pushes the tile very large.
    out_bytes = jnp.dtype(out_dtype).itemsize
    vmem_est = (2 * (tb * D * jnp.dtype(x.dtype).itemsize
                     + tb * H2p * out_bytes
                     + w1.size * w1.dtype.itemsize + w2.size * w2.dtype.itemsize
                     + (b1.size + b2.size) * 4)
                + tb * H1p * 4)
    cp_kwargs = dict(dimension_semantics=("parallel",))
    if vmem_est > 24 * 1024 * 1024:
        cp_kwargs["vmem_limit_bytes"] = min(int(vmem_est * 1.5), 64 * 1024 * 1024)

    out = pl.pallas_call(
        _mlp_kernel,
        out_shape=jax.ShapeDtypeStruct((B, H2p), out_dtype),
        grid_spec=pl.GridSpec(
            grid=grid,
            in_specs=[
                # Only the batch axis is tiled; weight/bias blocks have a constant
                # block index, so they stay resident in VMEM across the grid.
                pl.BlockSpec((tb, D), lambda i: (i, 0)),
                pl.BlockSpec((D, H1p), lambda i: (0, 0)),
                pl.BlockSpec((1, H1p), lambda i: (0, 0)),
                pl.BlockSpec((H1p, H2p), lambda i: (0, 0)),
                pl.BlockSpec((1, H2p), lambda i: (0, 0)),
            ],
            out_specs=pl.BlockSpec((tb, H2p), lambda i: (i, 0)),
        ),
        compiler_params=pltpu.CompilerParams(**cp_kwargs),
    )(x, w1, b1, w2, b2)

    if pad_output or H2p == out_features:
        return out          # padded cols are exactly zero; skip the extra HBM pass
    return out[:, :out_features]


def init_params(key, input_dim, layers=(100, 100)):
    """Deterministic init mimicking nn.Linear default (uniform +-1/sqrt(fan_in)).
    Returns weights already transposed to (in, out)."""
    params = []
    n_in = input_dim
    for n_out in layers:
        key, kw, kb = jax.random.split(key, 3)
        bound = 1.0 / jnp.sqrt(jnp.float32(n_in))
        w = jax.random.uniform(kw, (n_in, n_out), jnp.float32, -bound, bound)
        b = jax.random.uniform(kb, (1, n_out), jnp.float32, -bound, bound)
        params.append((w, b))
        n_in = n_out
    return params


def reference_forward(x, params):
    (w1, b1), (w2, b2) = params
    h = jnp.maximum(x @ w1 + b1, 0.0)
    return h @ w2 + b2


if __name__ == "__main__":
    key = jax.random.PRNGKey(0)
    batch, input_dim = 16, 32
    layers = (100, 100)

    key, kx = jax.random.split(key)
    x = jax.random.normal(kx, (batch, input_dim), jnp.float32)
    (w1, b1), (w2, b2) = init_params(key, input_dim, layers)
    ref = reference_forward(x, [(w1, b1), (w2, b2)])

    # f32 path (tiny batch -> single block, exact vs reference).
    out = jax.block_until_ready(protonet_encoder_forward(x, w1, b1, w2, b2))
    assert out.shape == (batch, layers[-1]), out.shape
    assert jnp.allclose(out, ref, atol=1e-4, rtol=1e-4), "f32 mismatch vs reference"

    # bf16 MXU-operand path with params prepared/cast once; x is cast in-kernel.
    w1p, b1p, w2p, b2p, out_feats = prepare_params(w1, b1, w2, b2, use_bf16=True)
    out_bf16 = jax.block_until_ready(
        protonet_encoder_forward(x, w1p, b1p, w2p, b2p, out_features=out_feats,
                                 use_bf16=True))
    assert out_bf16.shape == (batch, layers[-1]), out_bf16.shape
    assert jnp.allclose(out_bf16, ref, atol=5e-2, rtol=5e-2), "bf16 mismatch"

    # Non-divisible batch -> multi-step grid with a ragged, masked last block
    # (no wrapper-side row padding / output row slicing).
    x2 = jax.random.normal(jax.random.PRNGKey(1), (130, input_dim), jnp.float32)
    out2 = jax.block_until_ready(
        protonet_encoder_forward(x2, w1, b1, w2, b2, tile_b=64))
    ref2 = reference_forward(x2, [(w1, b1), (w2, b2)])
    assert out2.shape == (130, layers[-1]), out2.shape
    assert jnp.allclose(out2, ref2, atol=1e-4, rtol=1e-4), "ragged-batch mismatch"

    # Padded 128-wide bf16 output (for consumers that tolerate the zero columns).
    out3 = jax.block_until_ready(
        protonet_encoder_forward(x, w1, b1, w2, b2, pad_output=True,
                                 out_dtype=jnp.bfloat16))
    assert out3.shape == (batch, 128) and out3.dtype == jnp.bfloat16, (out3.shape, out3.dtype)
    assert jnp.allclose(out3[:, :layers[-1]].astype(jnp.float32), ref,
                        atol=5e-2, rtol=5e-2), "padded bf16 output mismatch"

    print("KERNEL_OK")
</pallas_src>

<mosaic_0001>
module attributes {stable_mosaic.version = 11 : i64} {
  func.func @_mlp_kernel(%arg0: i32, %arg1: memref<16x32xf32, #tpu.memory_space<vmem>>, %arg2: memref<32x128xf32, #tpu.memory_space<vmem>>, %arg3: memref<1x128xf32, #tpu.memory_space<vmem>>, %arg4: memref<128x128xf32, #tpu.memory_space<vmem>>, %arg5: memref<1x128xf32, #tpu.memory_space<vmem>>, %arg6: memref<16x128xf32, #tpu.memory_space<vmem>>) attributes {dimension_semantics = [#tpu.dimension_semantics<parallel>], iteration_bounds = array<i64: 1>, scalar_prefetch = 0 : i64, scratch_operands = 0 : i64, tpu.core_type = #tpu.core_type<tc>, window_params = [{transform_indices = @transform_0, window_bounds = array<i64: 16, 32>}, {pipeline_mode = #tpu.pipeline_mode<synchronous>, transform_indices = @transform_1, window_bounds = array<i64: 32, 128>}, {pipeline_mode = #tpu.pipeline_mode<synchronous>, transform_indices = @transform_2, window_bounds = array<i64: 1, 128>}, {pipeline_mode = #tpu.pipeline_mode<synchronous>, transform_indices = @transform_3, window_bounds = array<i64: 128, 128>}, {pipeline_mode = #tpu.pipeline_mode<synchronous>, transform_indices = @transform_4, window_bounds = array<i64: 1, 128>}, {transform_indices = @transform_5, window_bounds = array<i64: 16, 128>}]} {
    %c0 = arith.constant 0 : index
    %c0_0 = arith.constant 0 : index
    %0 = vector.load %arg1[%c0, %c0_0] : memref<16x32xf32, #tpu.memory_space<vmem>>, vector<16x32xf32>
    %c0_1 = arith.constant 0 : index
    %c0_2 = arith.constant 0 : index
    %1 = vector.load %arg2[%c0_1, %c0_2] : memref<32x128xf32, #tpu.memory_space<vmem>>, vector<32x128xf32>
    %cst = arith.constant dense<0.000000e+00> : vector<16x128xf32>
    %2 = tpu.matmul %0, %1, %cst {dimension_numbers = #tpu.dot_dimension_numbers<[1], [0], [0], [1], [0, 0, 1, 1], [], []>} : vector<16x32xf32>, vector<32x128xf32>, vector<16x128xf32> -> vector<16x128xf32>
    %c0_3 = arith.constant 0 : index
    %c0_4 = arith.constant 0 : index
    %3 = vector.load %arg3[%c0_3, %c0_4] : memref<1x128xf32, #tpu.memory_space<vmem>>, vector<1x128xf32>
    %4 = vector.broadcast %3 : vector<1x128xf32> to vector<16x128xf32>
    %5 = arith.addf %2, %4 : vector<16x128xf32>
    %cst_5 = arith.constant 0.000000e+00 : f32
    %6 = vector.broadcast %cst_5 : f32 to vector<16x128xf32>
    %7 = arith.maximumf %5, %6 : vector<16x128xf32>
    %c0_6 = arith.constant 0 : index
    %c0_7 = arith.constant 0 : index
    %8 = vector.load %arg4[%c0_6, %c0_7] : memref<128x128xf32, #tpu.memory_space<vmem>>, vector<128x128xf32>
    %cst_8 = arith.constant dense<0.000000e+00> : vector<16x128xf32>
    %9 = tpu.matmul %7, %8, %cst_8 {dimension_numbers = #tpu.dot_dimension_numbers<[1], [0], [0], [1], [0, 0, 1, 1], [], []>} : vector<16x128xf32>, vector<128x128xf32>, vector<16x128xf32> -> vector<16x128xf32>
    %c0_9 = arith.constant 0 : index
    %c0_10 = arith.constant 0 : index
    %10 = vector.load %arg5[%c0_9, %c0_10] : memref<1x128xf32, #tpu.memory_space<vmem>>, vector<1x128xf32>
    %11 = vector.broadcast %10 : vector<1x128xf32> to vector<16x128xf32>
    %12 = arith.addf %9, %11 : vector<16x128xf32>
    %c0_11 = arith.constant 0 : index
    %c0_12 = arith.constant 0 : index
    %13 = vector.load %arg6[%c0_11, %c0_12] : memref<16x128xf32, #tpu.memory_space<vmem>>, vector<16x128xf32>
    tpu.vector_store %arg6[%c0_11, %c0_12], %12 {strides = array<i32>} : memref<16x128xf32, #tpu.memory_space<vmem>>, vector<16x128xf32>,
    return
  }
  func.func @transform_0(%arg0: i32) -> (i32, i32) {
    %c0_i32 = arith.constant 0 : i32
    %c0_i32_0 = arith.constant 0 : i32
    return %arg0, %c0_i32 : i32, i32
  }
  func.func @transform_1(%arg0: i32) -> (i32, i32) {
    %c0_i32 = arith.constant 0 : i32
    %c0_i32_0 = arith.constant 0 : i32
    %c0_i32_1 = arith.constant 0 : i32
    return %c0_i32, %c0_i32_0 : i32, i32
  }
  func.func @transform_2(%arg0: i32) -> (i32, i32) {
    %c0_i32 = arith.constant 0 : i32
    %c0_i32_0 = arith.constant 0 : i32
    %c0_i32_1 = arith.constant 0 : i32
    return %c0_i32, %c0_i32_0 : i32, i32
  }
  func.func @transform_3(%arg0: i32) -> (i32, i32) {
    %c0_i32 = arith.constant 0 : i32
    %c0_i32_0 = arith.constant 0 : i32
    %c0_i32_1 = arith.constant 0 : i32
    return %c0_i32, %c0_i32_0 : i32, i32
  }
  func.func @transform_4(%arg0: i32) -> (i32, i32) {
    %c0_i32 = arith.constant 0 : i32
    %c0_i32_0 = arith.constant 0 : i32
    %c0_i32_1 = arith.constant 0 : i32
    return %c0_i32, %c0_i32_0 : i32, i32
  }
  func.func @transform_5(%arg0: i32) -> (i32, i32) {
    %c0_i32 = arith.constant 0 : i32
    %c0_i32_0 = arith.constant 0 : i32
    return %arg0, %c0_i32 : i32, i32
  }
}

</mosaic_0001>

<bundles_post_ra>
// kernel: tpu_custom_call.1
= control target key start
LH: loop header
LB: loop body
LE: loop exit
PB: predicated region body
PF: predicated region fallthrough
CT: control target
= control target key end

     0   :  { %10 = vsyncpa [#allocation3], 0  ;;  %s371_s0 = inlined_call_operand.hbm [shape: f32[16,32], index: 0, kind: input, shape index: {}]   ;;  %s372_s1 = inlined_call_operand.hbm [shape: f32[32,128], index: 1, kind: input, shape index: {}]   ;;  %s373_s2 = inlined_call_operand.vmem [shape: f32[1,128], index: 2, kind: input, shape index: {}]   ;;  %s374_s3 = inlined_call_operand.hbm [shape: f32[128,128], index: 3, kind: input, shape index: {}]   ;;  %s375_s4 = inlined_call_operand.vmem [shape: f32[1,128], index: 4, kind: input, shape index: {}]   ;;  %s376_s5 = inlined_call_operand.hbm [shape: f32[16,128], index: 5, kind: output, shape index: {}]  }
   0x1   :  { %11 = vsyncpa [#allocation6], 0 }
   0x2   :  { %12 = vsyncpa [#allocation4], 0  ;;  %s30_s20 = sshll.u32 %s372_s1, 4  ;;  %s303_s21 = smov [#allocation5]   ;;  %s31_s20 = int_to_ptr.hbm [resolvable:$true] %s30_s20 }
   0x3   :  { %s32_s22 = sshll.u32 %s303_s21, 4  ;;  %s17_s25 = sshll.u32 %s371_s0, 4  ;;  %s33_s22 = int_to_ptr.vmem [resolvable:$true] %s32_s22  ;;  %s18_s25 = int_to_ptr.hbm [resolvable:$true] %s17_s25 }
   0x4   :  { %s304_s26 = smov 128   ;;  %s305_s27 = smov 8  }
   0x5   :  { %38 = dma.hbm_to_vmem [thread:$0]  %s31_s20, 512, %s33_s22, [#allocation6], %s304_s26, %s304_s26, %s305_s27  }
   0x6   :  { %s306_s28 = smov [#allocation2]   ;;  %s45_s1 = sshll.u32 %s374_s3, 4  ;;  %s46_s1 = int_to_ptr.hbm [resolvable:$true] %s45_s1 }
   0x7   :  { %s19_s29 = sshll.u32 %s306_s28, 4  ;;  %s307_s0 = smov [#allocation7]   ;;  %s20_s29 = int_to_ptr.vmem [resolvable:$true] %s19_s29 }
   0x8   :  { %25 = dma.hbm_to_vmem [thread:$0]  %s18_s25, 256, %s20_s29, [#allocation3], %s304_s26, %s304_s26, %s305_s27  }
   0x9   :  { %s47_s7 = sshll.u32 %s307_s0, 4  ;;  %s48_s7 = int_to_ptr.vmem [resolvable:$true] %s47_s7 }
   0xa   :  { %53 = dma.hbm_to_vmem [thread:$0]  %s46_s1, 2048, %s48_s7, [#allocation6], %s304_s26, %s304_s26, %s305_s27  }
   0xb   :  { %297 = dma.done.wait [#allocation3], 256  }
   0xc   :  { %298 = vsyncadd [#allocation3], 4294967040 }
   0xd   :  { %299 = dma.done.wait [#allocation6], 2560  }
   0xe   :  { %300 = vsyncadd [#allocation6], 4294964736  ;;  %v73_v0 = vld [vmem:[#allocation5 + $0x18] sm:$0xff]  ;;  %v72_v1 = vld [vmem:[#allocation5 + $0x10] sm:$0xff]  ;;  %vm78_vm0 = vcmask 261120   ;;  %s308_s11 = smov [#allocation8]  }
   0xf   :  { %97 = vmatpush.msra.mxu0 %v73_v0  ;;  %v71_v2 = vld [vmem:[#allocation5 + $0x8] sm:$0xff]  ;;  %v125_v3 = vld [vmem:[#allocation7 + $0x78] sm:$0xff]  ;;  %v124_v4 = vld [vmem:[#allocation7 + $0x70] sm:$0xff]  ;;  %s159_s12 = sshll.u32 %s308_s11, 4  ;;  %s160_s12 = int_to_ptr.vmem [resolvable:$true] %s159_s12 }
  0x10   :  { %130 = vmatpush.msra.mxu1 %v125_v3  ;;  %v70_v5 = vld [vmem:[#allocation5] sm:$0xff]  ;;  %v123_v6 = vld [vmem:[#allocation7 + $0x68] sm:$0xff]  ;;  %177 = vmatpush.msra.mxu2 %v125_v3  ;;  %v68_v7 = vld [vmem:[#allocation2] sm:$0xff] }
  0x11   :  { %98 = vmatpush.msra.mxu0 %v72_v1  ;;  %v122_v8 = vld [vmem:[#allocation7 + $0x60] sm:$0xff]  ;;  %v121_v9 = vld [vmem:[#allocation7 + $0x58] sm:$0xff]  ;;  %v120_v10 = vld [vmem:[#allocation7 + $0x50] sm:$0xff] }
  0x12   :  { %131 = vmatpush.msra.mxu1 %v124_v4  ;;  %178 = vmatpush.msra.mxu2 %v124_v4  ;;  %v119_v11 = vld [vmem:[#allocation7 + $0x48] sm:$0xff]  ;;  %v69_v12 = vld [vmem:[#allocation2 + $0x8] sm:$0xff]  ;;  %v118_v13 = vld [vmem:[#allocation7 + $0x40] sm:$0xff] }
  0x13   :  { %99 = vmatpush.msra.mxu0 %v71_v2  ;;  %v117_v14 = vld [vmem:[#allocation7 + $0x38] sm:$0xff]  ;;  %v116_v15 = vld [vmem:[#allocation7 + $0x30] sm:$0xff]  ;;  %v115_v16 = vld [vmem:[#allocation7 + $0x28] sm:$0xff] }
  0x14   :  { %132 = vmatpush.msra.mxu1 %v123_v6  ;;  %179 = vmatpush.msra.mxu2 %v123_v6  ;;  %v114_v17 = vld [vmem:[#allocation7 + $0x20] sm:$0xff]  ;;  %v113_v18 = vld [vmem:[#allocation7 + $0x18] sm:$0xff]  ;;  %v112_v19 = vld [vmem:[#allocation7 + $0x10] sm:$0xff] }
  0x15   :  { %100 = vmatpush.msra.mxu0 %v70_v5  ;;  %v111_v20 = vld [vmem:[#allocation7 + $0x8] sm:$0xff]  ;;  %v110_v21 = vld [vmem:[#allocation7] sm:$0xff]  ;;  %v199_v22 = vld [vmem:[%s373_s2] ss:$0 sm:$0xff]  ;;  %s161_s2 = sshll.u32 %s376_s5, 4  ;;  %s162_s2 = int_to_ptr.hbm [resolvable:$true] %s161_s2 }
  0x16   :  { %175 = vmatmul.msk.f32.vlgmr.msra.gmra.mxu0 %vm78_vm0, %v68_v7  ;;  %133 = vmatpush.msra.mxu1 %v122_v8  ;;  %v200_v29 = vld [vmem:[%s375_s4] ss:$0 sm:$0xff] }
  0x17   :  { %180 = vmatpush.msra.mxu2 %v122_v8 }
  0x18   :  { %134 = vmatpush.msra.mxu1 %v121_v9 }
  0x19   :  { %181 = vmatpush.msra.mxu2 %v121_v9 }
  0x1a   :  { %135 = vmatpush.msra.mxu1 %v120_v10 }
  0x1b   :  { %182 = vmatpush.msra.mxu2 %v120_v10 }
  0x1c   :  { %136 = vmatpush.msra.mxu1 %v119_v11 }
  0x1d   :  { %183 = vmatpush.msra.mxu2 %v119_v11 }
  0x1e   :  { %176 = vmatmul.msk.f32.gmra.mxu0 %vm78_vm0, %v69_v12  ;;  %137 = vmatpush.msra.mxu1 %v118_v13 }
  0x1f   :  { %184 = vmatpush.msra.mxu2 %v118_v13 }
  0x20   :  { %138 = vmatpush.msra.mxu1 %v117_v14 }
  0x21   :  { %185 = vmatpush.msra.mxu2 %v117_v14 }
  0x22   :  { %139 = vmatpush.msra.mxu1 %v116_v15 }
  0x23   :  { %186 = vmatpush.msra.mxu2 %v116_v15 }
  0x24   :  { %140 = vmatpush.msra.mxu1 %v115_v16 }
  0x25   :  { %187 = vmatpush.msra.mxu2 %v115_v16 }
  0x26   :  { %141 = vmatpush.msra.mxu1 %v114_v17 }
  0x27   :  { %188 = vmatpush.msra.mxu2 %v114_v17 }
  0x28   :  { %142 = vmatpush.msra.mxu1 %v113_v18 }
  0x29   :  { %189 = vmatpush.msra.mxu2 %v113_v18 }
  0x2a   :  { %143 = vmatpush.msra.mxu1 %v112_v19 }
  0x2b   :  { %190 = vmatpush.msra.mxu2 %v112_v19 }
  0x2c   :  { %144 = vmatpush.msra.mxu1 %v111_v20 }
  0x2d   :  { %191 = vmatpush.msra.mxu2 %v111_v20 }
  0x2e   :  { %145 = vmatpush.msra.mxu1 %v110_v21 }
  0x2f   :  { %192 = vmatpush.msra.mxu2 %v110_v21 }
  0x93   :  { %v102_v23 = vpop.f32.mrf.mxu0 }
  0x94   :  { %v103_v24 = vadd.f32 %v199_v22, %v102_v23 }
  0x96   :  { %v108_v25 = vmax.f32 %v103_v24, 0.0 }
  0x98   :  { %146 = vmatmul.f32.vlgmr.msra.gmra.mxu1 %v108_v25 }
  0x9b   :  { %v105_v26 = vpop.f32.mrf.mxu0 }
  0x9c   :  { %v106_v27 = vadd.f32 %v199_v22, %v105_v26 }
  0x9e   :  { %v109_v28 = vmax.f32 %v106_v27, 0.0 }
  0xa0   :  { %149 = vmatmul.f32.vlgmr.msra.gmra.mxu2 %v109_v28 }
 0x115   :  { %v147_v30 = vpop.f32.mrf.mxu1 }
 0x116   :  { %v148_v31 = vadd.f32 %v200_v29, %v147_v30 }
 0x118   :  { %153 = vst [vmem:[#allocation8] sm:$0xff] %v148_v31 }
 0x123   :  { %v150_v32 = vpop.f32.mrf.mxu2 }
 0x124   :  { %v151_v33 = vadd.f32 %v200_v29, %v150_v32 }
 0x126   :  { %154 = vst [vmem:[#allocation8 + $0x8] sm:$0xff] %v151_v33 }
 0x127   :  { %167 = dma.vmem_to_hbm [thread:$0]  %s160_s12, 256, %s162_s2, [#allocation4], %s304_s26, %s304_s26, %s305_s27  }
 0x128   :  { %301 = dma.done.wait [#allocation4], 256  }
 0x129   :  { %302 = vsyncadd [#allocation4], 4294967040 }
 0x12a   :  { %172 = vsyncpa [#allocation3], 1 }
 0x12b   :  { %173 = vsyncpa [#allocation6], 1 }
 0x12c   :  { %174 = vsyncpa [#allocation4], 1 }

</bundles_post_ra>
